<compile_context>
chip_gen: v7x
topology: tpu7x:2x2x1
jax: 0.10.0
libtpu: 0.0.40
codegen_flags: <defaults>
</compile_context>

<pallas_src>
import functools

import jax
import jax.numpy as jnp
from jax import lax
from jax.experimental import pallas as pl
from jax.experimental.pallas import tpu as pltpu

LANES = 128
SUBLANES = 8


def _cdiv(a: int, b: int) -> int:
    return -(-a // b)


def _round_down(a: int, b: int) -> int:
    return (a // b) * b


def _row_align(dtype) -> int:
    """Sublane packing: 8 rows for 4-byte, 16 for 2-byte, 32 for 1-byte dtypes."""
    return SUBLANES * max(1, 4 // jnp.dtype(dtype).itemsize)


def _target_block_bytes() -> int:
    """Per-input block budget.  ~2 MiB reaches >=85% of HBM roofline on
    v5e/v6e while keeping 2 inputs x 2 pipeline buffers (8 MiB) inside v5e's
    16 MiB default scoped VMEM; v7x's ~3.2 TB/s HBM needs ~4 MiB blocks to
    hide the fixed per-grid-step overhead (16 MiB total, inside the 32 MiB
    scoped default)."""
    try:
        kind = jax.devices()[0].device_kind.lower()
    except Exception:
        kind = ""
    if "v7" in kind or "7x" in kind:
        return 4 * 1024 * 1024
    return 2 * 1024 * 1024


def _iou_sum_f32(x, t, eps):
    x = x.astype(jnp.float32)
    t = t.astype(jnp.float32)
    inter = x * t
    union = x + t - inter
    return jnp.sum((inter + eps) / (union + eps))


def _iou_kernel(x_ref, t_ref, o_ref, *, eps, block_rows, valid_rows_last):
    step = pl.program_id(0)

    @pl.when(step == 0)
    def _():
        o_ref[...] = jnp.zeros_like(o_ref)

    x = x_ref[...].astype(jnp.float32)
    t = t_ref[...].astype(jnp.float32)
    inter = x * t
    union = x + t - inter
    iou = (inter + eps) / (union + eps)  # exact divide; masked tail stays exact

    def _accum(vals):
        # Partial-sum into a vreg-shaped (8, 128) accumulator: steady state is
        # pure VPU adds; the expensive cross-lane reduce happens once, outside.
        o_ref[...] += jnp.sum(vals.reshape(-1, SUBLANES, LANES), axis=0)

    if valid_rows_last == block_rows:
        # Every block is fully in-bounds: no masking code at all.
        _accum(iou)
    else:
        last = pl.num_programs(0) - 1

        @pl.when(step != last)
        def _():
            _accum(iou)

        @pl.when(step == last)
        def _():
            # Boundary block: rows past the array end hold unspecified data;
            # mask them out (valid_rows_last is a static Python int).
            row = lax.broadcasted_iota(jnp.int32, iou.shape, 0)
            _accum(jnp.where(row < valid_rows_last, iou, 0.0))


def iou_loss(inputs: jax.Array, target: jax.Array, *, eps: float = 1e-5,
             loss: bool = False) -> jax.Array:
    """JAX/Pallas equivalent of IoULoss.forward.

    The kernel is HBM-bandwidth bound and casts to f32 internally, so pass the
    narrowest native dtypes you have (bf16 activations, int8/bool targets) —
    halving input bytes is a direct wall-clock win on every TPU generation.
    """
    x = jnp.reshape(inputs, (-1,))
    t = jnp.reshape(target, (-1,))
    if x.dtype.itemsize > 4:
        x = x.astype(jnp.float32)
    if t.dtype.itemsize > 4:
        t = t.astype(jnp.float32)
    n = x.shape[0]

    rows = n // LANES
    main_n = rows * LANES
    lane_tail = n - main_n

    row_align = max(_row_align(x.dtype), _row_align(t.dtype))
    itemsize = max(x.dtype.itemsize, t.dtype.itemsize)
    max_rows = max(row_align,
                   _round_down(_target_block_bytes() // (LANES * itemsize), 32))

    if rows < row_align:
        # Tiny input: a kernel launch is not worth it.
        total = _iou_sum_f32(x, t, eps)
    else:
        block_rows = min(max_rows, _round_down(rows, row_align))
        steps = _cdiv(rows, block_rows)
        valid_rows_last = rows - (steps - 1) * block_rows

        if lane_tail:
            # TODO(synk): when n % 128 != 0 this prefix slice may cost one extra
            # HBM pass; a 1-D-block layout would avoid it entirely.
            x_main = x[:main_n]
            t_main = t[:main_n]
        else:
            x_main = x   # pure bitcast path: zero extra HBM traffic
            t_main = t
        x2 = x_main.reshape(rows, LANES)
        t2 = t_main.reshape(rows, LANES)

        partials = pl.pallas_call(
            functools.partial(_iou_kernel, eps=eps, block_rows=block_rows,
                              valid_rows_last=valid_rows_last),
            out_shape=jax.ShapeDtypeStruct((SUBLANES, LANES), jnp.float32),
            grid_spec=pltpu.PrefetchScalarGridSpec(
                num_scalar_prefetch=0,
                grid=(steps,),
                in_specs=[
                    pl.BlockSpec((block_rows, LANES), lambda i: (i, 0)),
                    pl.BlockSpec((block_rows, LANES), lambda i: (i, 0)),
                ],
                out_specs=pl.BlockSpec((SUBLANES, LANES), lambda i: (0, 0)),
            ),
            compiler_params=pltpu.CompilerParams(
                dimension_semantics=("arbitrary",)),
            cost_estimate=pl.CostEstimate(
                flops=7 * main_n,
                transcendentals=0,
                bytes_accessed=main_n * (x.dtype.itemsize + t.dtype.itemsize)
                + SUBLANES * LANES * 4),
        )(x2, t2)
        # TODO(synk): on v7x, add a leading CORE_PARALLEL grid axis (one resident
        # partial per TensorCore) to use both TCs for ~2x streaming bandwidth.

        total = jnp.sum(partials)
        if lane_tail:
            total = total + _iou_sum_f32(x[main_n:], t[main_n:], eps)

    mean_iou = total / jnp.float32(n)
    return (1.0 - mean_iou) if loss else mean_iou


def _iou_ref(inputs, target, eps=1e-5, loss=False):
    x = jnp.reshape(inputs, (-1,)).astype(jnp.float32)
    t = jnp.reshape(target, (-1,)).astype(jnp.float32)
    inter = x * t
    union = x + t - inter
    iou = jnp.mean((inter + eps) / (union + eps))
    return (1.0 - iou) if loss else iou


if __name__ == "__main__":
    key = jax.random.PRNGKey(0)
    k1, k2, k3, k4 = jax.random.split(key, 4)

    # Segmentation-style (N, C, H, W) inputs; n % 128 == 0 -> zero-copy path.
    inp = jax.nn.sigmoid(jax.random.normal(k1, (2, 4, 16, 16), jnp.float32))
    tgt = (jax.random.uniform(k2, (2, 4, 16, 16)) > 0.5).astype(jnp.float32)

    for loss_flag in (False, True):
        out = iou_loss(inp, tgt, eps=1e-5, loss=loss_flag)
        jax.block_until_ready(out)
        ref = _iou_ref(inp, tgt, eps=1e-5, loss=loss_flag)
        assert jnp.allclose(out, ref, atol=1e-5, rtol=1e-5), (loss_flag, out, ref)

    # Narrow native dtype (bf16 activations): kernel casts to f32 internally.
    inp_bf16 = inp.astype(jnp.bfloat16)
    out = iou_loss(inp_bf16, tgt, eps=1e-5)
    jax.block_until_ready(out)
    ref = _iou_ref(inp_bf16, tgt, eps=1e-5)
    assert jnp.allclose(out, ref, atol=1e-5, rtol=1e-5), (out, ref)

    # Row count not divisible by the block -> exercises the masked boundary block.
    inp2 = jax.nn.sigmoid(jax.random.normal(k3, (1, 19, 16, 8), jnp.float32))
    tgt2 = (jax.random.uniform(k4, (1, 19, 16, 8)) > 0.5).astype(jnp.float32)
    out = iou_loss(inp2, tgt2, eps=1e-5)
    jax.block_until_ready(out)
    ref = _iou_ref(inp2, tgt2, eps=1e-5)
    assert jnp.allclose(out, ref, atol=1e-5, rtol=1e-5), (out, ref)

    # Element count not divisible by 128 -> lane tail reduced in the wrapper.
    inp3 = jax.nn.sigmoid(jax.random.normal(k3, (3, 5, 13, 11), jnp.float32))
    tgt3 = (jax.random.uniform(k4, (3, 5, 13, 11)) > 0.5).astype(jnp.float32)
    out = iou_loss(inp3, tgt3, eps=1e-5)
    jax.block_until_ready(out)
    ref = _iou_ref(inp3, tgt3, eps=1e-5)
    assert jnp.allclose(out, ref, atol=1e-5, rtol=1e-5), (out, ref)

    print("KERNEL_OK")
</pallas_src>

<mosaic_0001>
module attributes {stable_mosaic.version = 11 : i64} {
  func.func @_iou_kernel(%arg0: i32, %arg1: memref<16x128xf32, #tpu.memory_space<vmem>>, %arg2: memref<16x128xf32, #tpu.memory_space<vmem>>, %arg3: memref<8x128xf32, #tpu.memory_space<vmem>>) attributes {dimension_semantics = [#tpu.dimension_semantics<arbitrary>], iteration_bounds = array<i64: 1>, scalar_prefetch = 0 : i64, scratch_operands = 0 : i64, tpu.core_type = #tpu.core_type<tc>, window_params = [{transform_indices = @transform_0, window_bounds = array<i64: 16, 128>}, {transform_indices = @transform_1, window_bounds = array<i64: 16, 128>}, {pipeline_mode = #tpu.pipeline_mode<synchronous>, transform_indices = @transform_2, window_bounds = array<i64: 8, 128>}]} {
    %c0_i32 = arith.constant 0 : i32
    %0 = arith.cmpi eq, %arg0, %c0_i32 : i32
    %1 = arith.extui %0 : i1 to i32
    %c0_i32_0 = arith.constant 0 : i32
    %2 = arith.cmpi ne, %1, %c0_i32_0 : i32
    scf.if %2 {
      %cst_10 = arith.constant 0.000000e+00 : f32
      %18 = vector.broadcast %cst_10 : f32 to vector<8x128xf32>
      %c0_11 = arith.constant 0 : index
      %c0_12 = arith.constant 0 : index
      %19 = vector.load %arg3[%c0_11, %c0_12] : memref<8x128xf32, #tpu.memory_space<vmem>>, vector<8x128xf32>
      tpu.vector_store %arg3[%c0_11, %c0_12], %18 {strides = array<i32>} : memref<8x128xf32, #tpu.memory_space<vmem>>, vector<8x128xf32>,
    } else {
    }
    %c0 = arith.constant 0 : index
    %c0_1 = arith.constant 0 : index
    %3 = vector.load %arg1[%c0, %c0_1] : memref<16x128xf32, #tpu.memory_space<vmem>>, vector<16x128xf32>
    %c0_2 = arith.constant 0 : index
    %c0_3 = arith.constant 0 : index
    %4 = vector.load %arg2[%c0_2, %c0_3] : memref<16x128xf32, #tpu.memory_space<vmem>>, vector<16x128xf32>
    %5 = arith.mulf %3, %4 : vector<16x128xf32>
    %6 = arith.addf %3, %4 : vector<16x128xf32>
    %7 = arith.subf %6, %5 : vector<16x128xf32>
    %cst = arith.constant 9.99999974E-6 : f32
    %8 = vector.broadcast %cst : f32 to vector<16x128xf32>
    %9 = arith.addf %5, %8 : vector<16x128xf32>
    %cst_4 = arith.constant 9.99999974E-6 : f32
    %10 = vector.broadcast %cst_4 : f32 to vector<16x128xf32>
    %11 = arith.addf %7, %10 : vector<16x128xf32>
    %12 = arith.divf %9, %11 : vector<16x128xf32>
    %c0_5 = arith.constant 0 : index
    %c0_6 = arith.constant 0 : index
    %13 = vector.load %arg3[%c0_5, %c0_6] : memref<8x128xf32, #tpu.memory_space<vmem>>, vector<8x128xf32>
    %14 = vector.shape_cast %12 : vector<16x128xf32> to vector<2x8x128xf32>
    %cst_7 = arith.constant dense<0.000000e+00> : vector<8x128xf32>
    %15 = vector.multi_reduction <add>, %14, %cst_7 [0] : vector<2x8x128xf32> to vector<8x128xf32>
    %16 = arith.addf %13, %15 : vector<8x128xf32>
    %c0_8 = arith.constant 0 : index
    %c0_9 = arith.constant 0 : index
    %17 = vector.load %arg3[%c0_8, %c0_9] : memref<8x128xf32, #tpu.memory_space<vmem>>, vector<8x128xf32>
    tpu.vector_store %arg3[%c0_8, %c0_9], %16 {strides = array<i32>} : memref<8x128xf32, #tpu.memory_space<vmem>>, vector<8x128xf32>,
    return
  }
  func.func @transform_0(%arg0: i32) -> (i32, i32) {
    %c0_i32 = arith.constant 0 : i32
    %c0_i32_0 = arith.constant 0 : i32
    return %arg0, %c0_i32 : i32, i32
  }
  func.func @transform_1(%arg0: i32) -> (i32, i32) {
    %c0_i32 = arith.constant 0 : i32
    %c0_i32_0 = arith.constant 0 : i32
    return %arg0, %c0_i32 : i32, i32
  }
  func.func @transform_2(%arg0: i32) -> (i32, i32) {
    %c0_i32 = arith.constant 0 : i32
    %c0_i32_0 = arith.constant 0 : i32
    %c0_i32_1 = arith.constant 0 : i32
    return %c0_i32, %c0_i32_0 : i32, i32
  }
}

</mosaic_0001>

<bundles_post_ra>
// kernel: tpu_custom_call.1
= control target key start
LH: loop header
LB: loop body
LE: loop exit
PB: predicated region body
PF: predicated region fallthrough
CT: control target
= control target key end

     0   :  { %7 = vsyncpa [#allocation3], 0  ;;  %s221_s0 = inlined_call_operand.hbm [shape: f32[16,128], index: 0, kind: input, shape index: {}]   ;;  %s222_s1 = inlined_call_operand.hbm [shape: f32[16,128], index: 1, kind: input, shape index: {}]   ;;  %s223_s2 = inlined_call_operand.hbm [shape: f32[8,128], index: 2, kind: output, shape index: {}]  }
   0x1   :  { %8 = vsyncpa [#allocation6], 0 }
   0x2   :  { %9 = vsyncpa [#allocation4], 0  ;;  %s165_s9 = smov [#allocation2]   ;;  %s93_s13 = scalar_lea.hbm %s221_s0, 256 }
   0x3   :  { %s15_s10 = sshll.u32 %s165_s9, 4  ;;  %p94_p0 = scmp.ne.s32.totalorder %s221_s0, %s93_s13  ;;  %s16_s10 = int_to_ptr.vmem [resolvable:$true] %s15_s10 }
   0x4   :  { %p97_p1 = scmp.lt.u32.totalorder %s93_s13, %s221_s0 }
   0x6   :  { %p99_p2 = pnand %p97_p1, %p94_p0 }
   0x8   :  { %102 = shalt.err (!%p99_p2)
}
   0x9   :  { %s103_s18 = scalar_lea.vmem %s16_s10, 256  ;;  %p108_p4 = scmp.lt.s32.totalorder %s16_s10, %s16_s10 }
   0xa   :  { %p104_p3 = scmp.ne.s32.totalorder %s16_s10, %s103_s18  ;;  %p109_p5 = scmp.lt.s32.totalorder %s103_s18, %s103_s18 }
   0xc   :  { %p110_p6 = por %p109_p5, %p108_p4 }
   0xe   :  { %p111_p7 = pnand %p110_p6, %p104_p3 }
  0x10   :  { %114 = shalt.err (!%p111_p7)
}
  0x11   :  { %s166_s19 = smov 128   ;;  %s167_s20 = smov 8  }
  0x12   :  { %21 = dma.hbm_to_vmem [thread:$0]  %s221_s0, 256, %s16_s10, [#allocation3], %s166_s19, %s166_s19, %s167_s20  }
  0x13   :  { %s168_s23 = smov [#allocation5]   ;;  %s115_s27 = scalar_lea.hbm %s222_s1, 256 }
  0x14   :  { %s27_s24 = sshll.u32 %s168_s23, 4  ;;  %p116_p8 = scmp.ne.s32.totalorder %s222_s1, %s115_s27  ;;  %s28_s24 = int_to_ptr.vmem [resolvable:$true] %s27_s24 }
  0x15   :  { %p119_p9 = scmp.lt.u32.totalorder %s115_s27, %s222_s1 }
  0x17   :  { %p121_p10 = pnand %p119_p9, %p116_p8 }
  0x19   :  { %124 = shalt.err (!%p121_p10)
}
  0x1a   :  { %s125_s4 = scalar_lea.vmem %s28_s24, 256  ;;  %p130_p12 = scmp.lt.s32.totalorder %s28_s24, %s28_s24 }
  0x1b   :  { %p126_p11 = scmp.ne.s32.totalorder %s28_s24, %s125_s4  ;;  %p131_p13 = scmp.lt.s32.totalorder %s125_s4, %s125_s4 }
  0x1d   :  { %p132_p0 = por %p131_p13, %p130_p12 }
  0x1f   :  { %p133_p1 = pnand %p132_p0, %p126_p11 }
  0x21   :  { %136 = shalt.err (!%p133_p1)
}
  0x22   :  { %33 = dma.hbm_to_vmem [thread:$0]  %s222_s1, 256, %s28_s24, [#allocation6], %s166_s19, %s166_s19, %s167_s20  }
  0x23   :  { %159 = dma.done.wait [#allocation3], 256  }
  0x24   :  { %160 = vsyncadd [#allocation3], 4294967040 }
  0x25   :  { %161 = dma.done.wait [#allocation6], 256  }
  0x26   :  { %162 = vsyncadd [#allocation6], 4294967040  ;;  %v45_v0 = vld [vmem:[#allocation2] sm:$0xff]  ;;  %v46_v1 = vld [vmem:[#allocation2 + $0x8] sm:$0xff]  ;;  %s169_s1 = smov [#allocation7]  }
  0x27   :  { %v47_v2 = vld [vmem:[#allocation5] sm:$0xff]  ;;  %v48_v3 = vld [vmem:[#allocation5 + $0x8] sm:$0xff]  ;;  %s73_s6 = sshll.u32 %s169_s1, 4  ;;  %s74_s6 = int_to_ptr.vmem [resolvable:$true] %s73_s6 }
  0x28   :  { %v49_v4 = vmul.f32 %v47_v2, %v45_v0  ;;  %v51_v5 = vadd.f32 %v47_v2, %v45_v0  ;;  %v50_v6 = vmul.f32 %v48_v3, %v46_v1  ;;  %v52_v7 = vadd.f32 %v48_v3, %v46_v1  ;;  %s137_s7 = scalar_lea.vmem %s74_s6, 128  ;;  %p142_p3 = scmp.lt.s32.totalorder %s74_s6, %s74_s6 }
  0x29   :  { %p138_p2 = scmp.ne.s32.totalorder %s74_s6, %s137_s7  ;;  %p143_p4 = scmp.lt.s32.totalorder %s137_s7, %s137_s7 }
  0x2a   :  { %v53_v8 = vsub.f32 %v51_v5, %v49_v4  ;;  %v54_v9 = vsub.f32 %v52_v7, %v50_v6  ;;  %v55_v12 = vadd.f32 1e-05, %v49_v4  ;;  %v56_v13 = vadd.f32 1e-05, %v50_v6 }
  0x2b   :  { %p144_p5 = por %p143_p4, %p142_p3 }
  0x2c   :  { %v57_v10 = vadd.f32 1e-05, %v53_v8  ;;  %v58_v11 = vadd.f32 1e-05, %v54_v9 }
  0x2d   :  { %p145_p6 = pnand %p144_p5, %p138_p2 }
  0x2e   :  { %89 = vrcp.f32 %v57_v10 }
  0x2f   :  { %91 = vrcp.f32 %v58_v11 }
  0x38   :  { %v90_v14 = vpop.eup %89 }
  0x39   :  { %v92_v15 = vpop.eup %91  ;;  %v60_v16 = vmul.f32 %v90_v14, %v55_v12 }
  0x3a   :  { %v62_v17 = vmul.f32 %v92_v15, %v56_v13 }
  0x3c   :  { %v64_v18 = vadd.f32 %v62_v17, %v60_v16 }
  0x3e   :  { %66 = vst [vmem:[#allocation7] sm:$0xff] %v64_v18 }
  0x3f   :  { %148 = shalt.err (!%p145_p6)
}
  0x40   :  { %s149_s10 = scalar_lea.hbm %s223_s2, 128 }
  0x41   :  { %p150_p7 = scmp.ne.s32.totalorder %s223_s2, %s149_s10  ;;  %p153_p8 = scmp.lt.u32.totalorder %s149_s10, %s223_s2 }
  0x43   :  { %p155_p9 = pnand %p153_p8, %p150_p7 }
  0x45   :  { %158 = shalt.err (!%p155_p9)
}
  0x46   :  { %76 = dma.vmem_to_hbm [thread:$0]  %s74_s6, 128, %s223_s2, [#allocation4]  }
  0x47   :  { %163 = dma.done.wait [#allocation4], 128  }
  0x48   :  { %164 = vsyncadd [#allocation4], 4294967168 }
  0x49   :  { %80 = vsyncpa [#allocation3], 1 }
  0x4a   :  { %81 = vsyncpa [#allocation6], 1 }
  0x4b   :  { %82 = vsyncpa [#allocation4], 1 }

</bundles_post_ra>
